<compile_context>
chip_gen: v7x
topology: tpu7x:2x2x1
jax: 0.10.0
libtpu: 0.0.40
codegen_flags: <defaults>
</compile_context>

<pallas_src>
import jax
import jax.numpy as jnp
from jax import lax
from jax.experimental import pallas as pl
from jax.experimental.pallas import tpu as pltpu


def _round_up(x, m):
    return (x + m - 1) // m * m


def _pose_head_kernel(x_ref, w_ref, b_ref, ggt_ref, o_ref):
    # x:(TB, D) bf16   w:(D, Pp) bf16   b:(1, Pp) f32   ggt:(Pp, Pp) f32
    # o:(TB, Pp) f32,  Pp = round_up(num_pose * pose_dim, 128)
    y = jnp.dot(x_ref[...], w_ref[...], preferred_element_type=jnp.float32)
    y = y + b_ref[...]                       # broadcast (1, Pp) -> (TB, Pp)
    sq = y * y
    # block-diagonal GGt: ss[:, p] = sum of squares of the pose containing lane p
    ss = jnp.dot(sq, ggt_ref[...], preferred_element_type=jnp.float32)
    o_ref[...] = y * lax.rsqrt(ss)           # == q / ||q||_2 (no eps, like torch.norm)


def prepare_pose_head_params(weight, bias, num_pose, pose_dim,
                             compute_dtype=jnp.bfloat16):
    """One-time parameter prep (do NOT call per step; avoids a per-call W^T).

    weight: (num_pose*pose_dim, input_dim)  [PyTorch nn.Linear layout]
    bias:   (num_pose*pose_dim,)
    Returns (w_t, b2, ggt):
      w_t : (input_dim, P_pad) compute_dtype, lane-dense, zero-padded columns
      b2  : (1, P_pad) f32; padded lanes set to 1.0 so padded poses never hit
            rsqrt(0) (their values are sliced away by the wrapper anyway)
      ggt : (P_pad, P_pad) f32 block-diagonal "same-pose" indicator matrix
    """
    P, D = weight.shape
    assert P == num_pose * pose_dim and bias.shape == (P,)
    P_pad = _round_up(P, 128)

    w_t = jnp.zeros((D, P_pad), compute_dtype)
    w_t = w_t.at[:, :P].set(weight.T.astype(compute_dtype))

    b2 = jnp.ones((1, P_pad), jnp.float32)
    b2 = b2.at[0, :P].set(bias.astype(jnp.float32))

    groups = jnp.arange(P_pad) // pose_dim            # pose id of each lane
    ggt = (groups[:, None] == groups[None, :]).astype(jnp.float32)
    return w_t, b2, ggt


def basic_pose_head(x, w_t, b2, ggt, num_pose, pose_dim,
                    block_b=256, compute_dtype=jnp.bfloat16):
    """x: (B, input_dim). Returns (B, num_pose, pose_dim) float32."""
    B, D = x.shape
    P = num_pose * pose_dim
    P_pad = w_t.shape[1]
    assert w_t.shape == (D, P_pad) and b2.shape == (1, P_pad)
    assert ggt.shape == (P_pad, P_pad)

    x_itm = jnp.dtype(compute_dtype).itemsize
    # Resident across the whole grid: weight + bias + GGt.
    resident = D * P_pad * x_itm + P_pad * P_pad * 4 + P_pad * 4
    # Largest batch tile (multiple of 8) whose double-buffered x/out tiles fit
    # a conservative budget (safe for v7x's 64 MiB VMEM per core).
    tile_budget = 24 * 1024 * 1024
    TB = max(8, min(_round_up(B, 8), block_b))
    while TB > 8 and 2 * TB * (D * x_itm + P_pad * 4) > tile_budget:
        TB //= 2
    TB = max(8, _round_up(TB, 8))

    B_pad = _round_up(B, TB)
    x_c = x.astype(compute_dtype)
    if B_pad != B:
        x_c = jnp.zeros((B_pad, D), compute_dtype).at[:B].set(x_c)

    vmem_limit = int(min(
        max(32 * 1024 * 1024,
            2 * (resident + 2 * TB * (D * x_itm + P_pad * 4))),
        64 * 1024 * 1024))

    # TODO(synk): for very large input_dim, add a K-reduction grid axis (last,
    # "arbitrary") with an f32 VMEM accumulator instead of keeping the whole
    # (D, P_pad) weight block resident in VMEM.
    out = pl.pallas_call(
        _pose_head_kernel,
        out_shape=jax.ShapeDtypeStruct((B_pad, P_pad), jnp.float32),
        grid=(B_pad // TB,),
        in_specs=[
            pl.BlockSpec((TB, D), lambda i: (i, 0)),         # streamed per tile
            pl.BlockSpec((D, P_pad), lambda i: (0, 0)),      # resident weight
            pl.BlockSpec((1, P_pad), lambda i: (0, 0)),      # resident bias
            pl.BlockSpec((P_pad, P_pad), lambda i: (0, 0)),  # resident GGt
        ],
        out_specs=pl.BlockSpec((TB, P_pad), lambda i: (i, 0)),
        compiler_params=pltpu.CompilerParams(
            dimension_semantics=("parallel",),
            vmem_limit_bytes=vmem_limit),
    )(x_c, w_t, b2, ggt)

    return out[:B, :P].reshape(B, num_pose, pose_dim)


if __name__ == "__main__":
    # Small, deterministic example consistent with the module.
    B, input_dim, num_pose, pose_dim = 8, 32, 8, 4
    key = jax.random.PRNGKey(0)
    kx, kw, kb = jax.random.split(key, 3)

    x = jax.random.normal(kx, (B, input_dim), dtype=jnp.float32)
    # deterministic "Linear" params (synthetic, not a checkpoint)
    weight = jax.random.normal(kw, (num_pose * pose_dim, input_dim), dtype=jnp.float32) * 0.1
    bias = jax.random.normal(kb, (num_pose * pose_dim,), dtype=jnp.float32) * 0.1

    w_t, b2, ggt = prepare_pose_head_params(weight, bias, num_pose, pose_dim)
    out = basic_pose_head(x, w_t, b2, ggt, num_pose, pose_dim)
    out = jax.block_until_ready(out)
    assert out.shape == (B, num_pose, pose_dim)
    assert bool(jnp.all(jnp.isfinite(out)))

    # Reference with the same bf16 quantization of the MXU operands as the
    # kernel (apples-to-apples check of kernel logic; the bf16 cast is the only
    # intended deviation from the pure-f32 torch forward).
    xq = x.astype(jnp.bfloat16).astype(jnp.float32)
    wq = weight.astype(jnp.bfloat16).astype(jnp.float32)
    y_ref = xq @ wq.T + bias
    q_ref = y_ref.reshape(-1, num_pose, pose_dim)
    q_ref = q_ref / jnp.linalg.norm(q_ref, ord=2, axis=-1, keepdims=True)
    max_err = float(jnp.max(jnp.abs(out - q_ref)))
    assert jnp.allclose(out, q_ref, atol=1e-3, rtol=1e-3), max_err

    print("KERNEL_OK")
</pallas_src>

<mosaic_0001>
module attributes {stable_mosaic.version = 11 : i64} {
  func.func @_pose_head_kernel(%arg0: i32, %arg1: memref<8x32xbf16, #tpu.memory_space<vmem>>, %arg2: memref<32x128xbf16, #tpu.memory_space<vmem>>, %arg3: memref<1x128xf32, #tpu.memory_space<vmem>>, %arg4: memref<128x128xf32, #tpu.memory_space<vmem>>, %arg5: memref<8x128xf32, #tpu.memory_space<vmem>>) attributes {dimension_semantics = [#tpu.dimension_semantics<parallel>], iteration_bounds = array<i64: 1>, scalar_prefetch = 0 : i64, scratch_operands = 0 : i64, tpu.core_type = #tpu.core_type<tc>, window_params = [{transform_indices = @transform_0, window_bounds = array<i64: 8, 32>}, {pipeline_mode = #tpu.pipeline_mode<synchronous>, transform_indices = @transform_1, window_bounds = array<i64: 32, 128>}, {pipeline_mode = #tpu.pipeline_mode<synchronous>, transform_indices = @transform_2, window_bounds = array<i64: 1, 128>}, {pipeline_mode = #tpu.pipeline_mode<synchronous>, transform_indices = @transform_3, window_bounds = array<i64: 128, 128>}, {transform_indices = @transform_4, window_bounds = array<i64: 8, 128>}]} {
    %c0 = arith.constant 0 : index
    %c0_0 = arith.constant 0 : index
    %0 = vector.load %arg1[%c0, %c0_0] : memref<8x32xbf16, #tpu.memory_space<vmem>>, vector<8x32xbf16>
    %c0_1 = arith.constant 0 : index
    %c0_2 = arith.constant 0 : index
    %1 = vector.load %arg2[%c0_1, %c0_2] : memref<32x128xbf16, #tpu.memory_space<vmem>>, vector<32x128xbf16>
    %cst = arith.constant dense<0.000000e+00> : vector<8x128xf32>
    %2 = tpu.matmul %0, %1, %cst {dimension_numbers = #tpu.dot_dimension_numbers<[1], [0], [0], [1], [0, 0, 1, 1], [], []>} : vector<8x32xbf16>, vector<32x128xbf16>, vector<8x128xf32> -> vector<8x128xf32>
    %c0_3 = arith.constant 0 : index
    %c0_4 = arith.constant 0 : index
    %3 = vector.load %arg3[%c0_3, %c0_4] : memref<1x128xf32, #tpu.memory_space<vmem>>, vector<1x128xf32>
    %4 = vector.broadcast %3 : vector<1x128xf32> to vector<8x128xf32>
    %5 = arith.addf %2, %4 : vector<8x128xf32>
    %6 = arith.mulf %5, %5 : vector<8x128xf32>
    %c0_5 = arith.constant 0 : index
    %c0_6 = arith.constant 0 : index
    %7 = vector.load %arg4[%c0_5, %c0_6] : memref<128x128xf32, #tpu.memory_space<vmem>>, vector<128x128xf32>
    %cst_7 = arith.constant dense<0.000000e+00> : vector<8x128xf32>
    %8 = tpu.matmul %6, %7, %cst_7 {dimension_numbers = #tpu.dot_dimension_numbers<[1], [0], [0], [1], [0, 0, 1, 1], [], []>} : vector<8x128xf32>, vector<128x128xf32>, vector<8x128xf32> -> vector<8x128xf32>
    %9 = math.rsqrt %8 : vector<8x128xf32>
    %10 = arith.mulf %5, %9 : vector<8x128xf32>
    %c0_8 = arith.constant 0 : index
    %c0_9 = arith.constant 0 : index
    %11 = vector.load %arg5[%c0_8, %c0_9] : memref<8x128xf32, #tpu.memory_space<vmem>>, vector<8x128xf32>
    tpu.vector_store %arg5[%c0_8, %c0_9], %10 {strides = array<i32>} : memref<8x128xf32, #tpu.memory_space<vmem>>, vector<8x128xf32>,
    return
  }
  func.func @transform_0(%arg0: i32) -> (i32, i32) {
    %c0_i32 = arith.constant 0 : i32
    %c0_i32_0 = arith.constant 0 : i32
    return %arg0, %c0_i32 : i32, i32
  }
  func.func @transform_1(%arg0: i32) -> (i32, i32) {
    %c0_i32 = arith.constant 0 : i32
    %c0_i32_0 = arith.constant 0 : i32
    %c0_i32_1 = arith.constant 0 : i32
    return %c0_i32, %c0_i32_0 : i32, i32
  }
  func.func @transform_2(%arg0: i32) -> (i32, i32) {
    %c0_i32 = arith.constant 0 : i32
    %c0_i32_0 = arith.constant 0 : i32
    %c0_i32_1 = arith.constant 0 : i32
    return %c0_i32, %c0_i32_0 : i32, i32
  }
  func.func @transform_3(%arg0: i32) -> (i32, i32) {
    %c0_i32 = arith.constant 0 : i32
    %c0_i32_0 = arith.constant 0 : i32
    %c0_i32_1 = arith.constant 0 : i32
    return %c0_i32, %c0_i32_0 : i32, i32
  }
  func.func @transform_4(%arg0: i32) -> (i32, i32) {
    %c0_i32 = arith.constant 0 : i32
    %c0_i32_0 = arith.constant 0 : i32
    return %arg0, %c0_i32 : i32, i32
  }
}

</mosaic_0001>

<bundles_post_ra>
// kernel: tpu_custom_call.1
= control target key start
LH: loop header
LB: loop body
LE: loop exit
PB: predicated region body
PF: predicated region fallthrough
CT: control target
= control target key end

     0   :  { %9 = vsyncpa [#allocation3], 0  ;;  %s519_s0 = inlined_call_operand.hbm [shape: bf16[8,32], index: 0, kind: input, shape index: {}]   ;;  %s520_s1 = inlined_call_operand.hbm [shape: bf16[32,128], index: 1, kind: input, shape index: {}]   ;;  %s521_s2 = inlined_call_operand.vmem [shape: f32[1,128], index: 2, kind: input, shape index: {}]   ;;  %s522_s3 = inlined_call_operand.hbm [shape: f32[128,128], index: 3, kind: input, shape index: {}]   ;;  %s523_s4 = inlined_call_operand.hbm [shape: f32[8,128], index: 4, kind: output, shape index: {}]  }
   0x1   :  { %10 = vsyncpa [#allocation6], 0 }
   0x2   :  { %11 = vsyncpa [#allocation4], 0  ;;  %s432_s15 = smov [#allocation5]   ;;  %s338_s19 = scalar_lea.hbm %s520_s1, 256 }
   0x3   :  { %s27_s16 = sshll.u32 %s432_s15, 4  ;;  %p339_p0 = scmp.ne.s32.totalorder %s520_s1, %s338_s19  ;;  %s28_s16 = int_to_ptr.vmem [resolvable:$true] %s27_s16 }
   0x4   :  { %p342_p1 = scmp.lt.u32.totalorder %s338_s19, %s520_s1 }
   0x6   :  { %p344_p2 = pnand %p342_p1, %p339_p0 }
   0x8   :  { %347 = shalt.err (!%p344_p2)
}
   0x9   :  { %s348_s24 = scalar_lea.vmem %s28_s16, 256  ;;  %p353_p4 = scmp.lt.s32.totalorder %s28_s16, %s28_s16 }
   0xa   :  { %p349_p3 = scmp.ne.s32.totalorder %s28_s16, %s348_s24  ;;  %p354_p5 = scmp.lt.s32.totalorder %s348_s24, %s348_s24 }
   0xc   :  { %p355_p6 = por %p354_p5, %p353_p4 }
   0xe   :  { %p356_p7 = pnand %p355_p6, %p349_p3 }
  0x10   :  { %359 = shalt.err (!%p356_p7)
}
  0x11   :  { %s433_s25 = smov 64   ;;  %s434_s26 = smov 4  }
  0x12   :  { %33 = dma.hbm_to_vmem [thread:$0]  %s520_s1, 256, %s28_s16, [#allocation6], %s433_s25, %s433_s25, %s434_s26  }
  0x13   :  { %s435_s29 = smov [#allocation2]   ;;  %s436_s5 = smov [#allocation7]  }
  0x14   :  { %s18_s30 = sshll.u32 %s435_s29, 4  ;;  %s41_s6 = sshll.u32 %s436_s5, 4  ;;  %s19_s30 = int_to_ptr.vmem [resolvable:$true] %s18_s30  ;;  %s42_s6 = int_to_ptr.vmem [resolvable:$true] %s41_s6 }
  0x15   :  { %s360_s9 = scalar_lea.hbm %s519_s0, 64 }
  0x16   :  { %p361_p8 = scmp.ne.s32.totalorder %s519_s0, %s360_s9  ;;  %p364_p9 = scmp.lt.u32.totalorder %s360_s9, %s519_s0 }
  0x18   :  { %p366_p10 = pnand %p364_p9, %p361_p8 }
  0x1a   :  { %369 = shalt.err (!%p366_p10)
}
  0x1b   :  { %s370_s1 = scalar_lea.vmem %s19_s30, 64  ;;  %p375_p12 = scmp.lt.s32.totalorder %s19_s30, %s19_s30 }
  0x1c   :  { %p371_p11 = scmp.ne.s32.totalorder %s19_s30, %s370_s1  ;;  %p376_p13 = scmp.lt.s32.totalorder %s370_s1, %s370_s1 }
  0x1e   :  { %p377_p0 = por %p376_p13, %p375_p12 }
  0x20   :  { %p378_p1 = pnand %p377_p0, %p371_p11 }
  0x22   :  { %381 = shalt.err (!%p378_p1)
}
  0x23   :  { %21 = dma.hbm_to_vmem [thread:$0]  %s519_s0, 64, %s19_s30, [#allocation3]  }
  0x24   :  { %s382_s18 = scalar_lea.hbm %s522_s3, 2048 }
  0x25   :  { %p383_p2 = scmp.ne.s32.totalorder %s522_s3, %s382_s18  ;;  %p386_p3 = scmp.lt.u32.totalorder %s382_s18, %s522_s3 }
  0x27   :  { %p388_p4 = pnand %p386_p3, %p383_p2 }
  0x29   :  { %391 = shalt.err (!%p388_p4)
}
  0x2a   :  { %s392_s23 = scalar_lea.vmem %s42_s6, 2048  ;;  %p397_p6 = scmp.lt.s32.totalorder %s42_s6, %s42_s6 }
  0x2b   :  { %p393_p5 = scmp.ne.s32.totalorder %s42_s6, %s392_s23  ;;  %p398_p7 = scmp.lt.s32.totalorder %s392_s23, %s392_s23 }
  0x2d   :  { %p399_p8 = por %p398_p7, %p397_p6 }
  0x2f   :  { %p400_p9 = pnand %p399_p8, %p393_p5 }
  0x31   :  { %403 = shalt.err (!%p400_p9)
}
  0x32   :  { %s437_s0 = smov 128   ;;  %s438_s24 = smov 8  }
  0x33   :  { %47 = dma.hbm_to_vmem [thread:$0]  %s522_s3, 2048, %s42_s6, [#allocation6], %s437_s0, %s437_s0, %s438_s24  }
  0x34   :  { %426 = dma.done.wait [#allocation3], 64  }
  0x35   :  { %427 = vsyncadd [#allocation3], 4294967232 }
  0x36   :  { %428 = dma.done.wait [#allocation6], 2304  }
  0x37   :  { %429 = vsyncadd [#allocation6], 4294964992  ;;  %v439_v0 = vmov 0.0   ;;  %vm440_vm0 = vmmov 0   ;;  %v441_v1 = vmov 0.0|0.0   ;;  %v334_v2 = vld [vmem:[#allocation5] sm:$0xff]  }
  0x38   :  { %256 = vmatprep.subr.bf16.mxu0 %v439_v0  ;;  %260 = vmatprep.mubr.msk.bf16.mxu0 %vm440_vm0, %v439_v0  ;;  %v335_v3 = vld [vmem:[#allocation5 + $0x8] sm:$0xff]   ;;  %v127_v4 = vld [vmem:[#allocation7] sm:$0xff]  ;;  %v128_v5 = vld [vmem:[#allocation7 + $0x8] sm:$0xff]  ;;  %vm82_vm1 = vcmask 261120   ;;  %s442_s28 = smov [#allocation8]  }
  0x39   :  { %299 = vmatprep.subr.bf16.mxu1 %v441_v1  ;;  %296 = vmatprep.mubr.msk.f32.mxu1 %vm440_vm0, %v439_v0  ;;  %v300_v6 = vpack.c.bf16 %v128_v5, %v127_v4  ;;  %v129_v7 = vld [vmem:[#allocation7 + $0x10] sm:$0xff]  ;;  %v130_v8 = vld [vmem:[#allocation7 + $0x18] sm:$0xff]  ;;  %v58_v10 = vld [vmem:[#allocation2] sm:$0xf]  ;;  %s222_s29 = sshll.u32 %s442_s28, 4  ;;  %s223_s29 = int_to_ptr.vmem [resolvable:$true] %s222_s29 }
  0x3a   :  { %257 = vmatpush3.bf16.msra.mxu0 %v334_v2  ;;  %v303_v9 = vpack.c.bf16 %v130_v8, %v129_v7  ;;  %v131_v11 = vld [vmem:[#allocation7 + $0x20] sm:$0xff]  ;;  %v132_v12 = vld [vmem:[#allocation7 + $0x28] sm:$0xff]  ;;  %v133_v14 = vld [vmem:[#allocation7 + $0x30] sm:$0xff]  ;;  %s404_s30 = scalar_lea.vmem %s223_s29, 128  ;;  %p409_p11 = scmp.lt.s32.totalorder %s223_s29, %s223_s29 }
  0x3b   :  { %258 = vmatprep.subr.bf16.mxu0 %v439_v0  ;;  %301 = vmatpush3.bf16.msra.mxu1 %v300_v6  ;;  %v306_v13 = vpack.c.bf16 %v132_v12, %v131_v11  ;;  %v134_v15 = vld [vmem:[#allocation7 + $0x38] sm:$0xff]  ;;  %v135_v17 = vld [vmem:[#allocation7 + $0x40] sm:$0xff]  ;;  %v136_v18 = vld [vmem:[#allocation7 + $0x48] sm:$0xff]  ;;  %p405_p10 = scmp.ne.s32.totalorder %s223_s29, %s404_s30  ;;  %p410_p12 = scmp.lt.s32.totalorder %s404_s30, %s404_s30 }
  0x3c   :  { %302 = vmatprep.subr.bf16.mxu1 %v441_v1  ;;  %v309_v16 = vpack.c.bf16 %v134_v15, %v133_v14  ;;  %v312_v19 = vpack.c.bf16 %v136_v18, %v135_v17  ;;  %v137_v20 = vld [vmem:[#allocation7 + $0x50] sm:$0xff]  ;;  %v138_v21 = vld [vmem:[#allocation7 + $0x58] sm:$0xff]  ;;  %v139_v23 = vld [vmem:[#allocation7 + $0x60] sm:$0xff] }
  0x3d   :  { %v315_v22 = vpack.c.bf16 %v138_v21, %v137_v20  ;;  %v140_v24 = vld [vmem:[#allocation7 + $0x68] sm:$0xff]  ;;  %v141_v26 = vld [vmem:[#allocation7 + $0x70] sm:$0xff]  ;;  %v142_v27 = vld [vmem:[#allocation7 + $0x78] sm:$0xff]  ;;  %p411_p13 = por %p410_p12, %p409_p11 }
  0x3e   :  { %259 = vmatpush3.bf16.msra.mxu0 %v335_v3  ;;  %v318_v25 = vpack.c.bf16 %v140_v24, %v139_v23  ;;  %v321_v28 = vpack.c.bf16 %v142_v27, %v141_v26  ;;  %v232_v29 = vld [vmem:[%s521_s2] ss:$0 sm:$0xff] }
  0x3f   :  { %304 = vmatpush3.bf16.msra.mxu1 %v303_v9  ;;  %p412_p0 = pnand %p411_p13, %p405_p10 }
  0x40   :  { %305 = vmatprep.subr.bf16.mxu1 %v441_v1 }
  0x41   :  { %261 = vmatmul.mubr.msk.bf16.vlgmr.msra.gmra.mrb[0].mxu0 %vm82_vm1, %v58_v10 }
  0x43   :  { %307 = vmatpush3.bf16.msra.mxu1 %v306_v13 }
  0x44   :  { %308 = vmatprep.subr.bf16.mxu1 %v441_v1 }
  0x47   :  { %310 = vmatpush3.bf16.msra.mxu1 %v309_v16 }
  0x48   :  { %311 = vmatprep.subr.bf16.mxu1 %v441_v1 }
  0x4b   :  { %313 = vmatpush3.bf16.msra.mxu1 %v312_v19 }
  0x4c   :  { %314 = vmatprep.subr.bf16.mxu1 %v441_v1 }
  0x4f   :  { %316 = vmatpush3.bf16.msra.mxu1 %v315_v22 }
  0x50   :  { %317 = vmatprep.subr.bf16.mxu1 %v441_v1 }
  0x53   :  { %319 = vmatpush3.bf16.msra.mxu1 %v318_v25 }
  0x54   :  { %320 = vmatprep.subr.bf16.mxu1 %v441_v1 }
  0x57   :  { %322 = vmatpush3.bf16.msra.mxu1 %v321_v28 }
 0x114   :  { %v120_v30 = vpop.f32.mrb[0].mxu0 }
 0x115   :  { %v121_v31 = vadd.f32 %v232_v29, %v120_v30  ;;  %v262_v32 = vpop.f32.mrb[1].mxu0 }
 0x116   :  { %v123_v33 = vpop.f32.mrb[2].mxu0 }
 0x117   :  { %v126_v34 = vmul.f32 %v121_v31, %v121_v31  ;;  %v263_v35 = vpop.f32.mrb[3].mxu0 }
 0x119   :  { %297 = vmatmul.mubr.f32.vlgmr.msra.gmra.mrb[0].mxu1 %v126_v34 }
 0x1ec   :  { %v209_v36 = vpop.f32.mrb[0].mxu1 }
 0x1ed   :  { %336 = vrsqrt.f32 %v209_v36  ;;  %v298_v37 = vpop.f32.mrb[1].mxu1 }
 0x1f7   :  { %v337_v38 = vpop.eup %336 }
 0x1f8   :  { %v214_v39 = vmul.f32 %v337_v38, %v121_v31 }
 0x1fa   :  { %215 = vst [vmem:[#allocation8] sm:$0xff] %v214_v39 }
 0x1fb   :  { %415 = shalt.err (!%p412_p0)
}
 0x1fc   :  { %s416_s6 = scalar_lea.hbm %s523_s4, 128 }
 0x1fd   :  { %p417_p1 = scmp.ne.s32.totalorder %s523_s4, %s416_s6  ;;  %p420_p2 = scmp.lt.u32.totalorder %s416_s6, %s523_s4 }
 0x1ff   :  { %p422_p3 = pnand %p420_p2, %p417_p1 }
 0x201   :  { %425 = shalt.err (!%p422_p3)
}
 0x202   :  { %225 = dma.vmem_to_hbm [thread:$0]  %s223_s29, 128, %s523_s4, [#allocation4]  }
 0x203   :  { %430 = dma.done.wait [#allocation4], 128  }
 0x204   :  { %431 = vsyncadd [#allocation4], 4294967168 }
 0x205   :  { %229 = vsyncpa [#allocation3], 1 }
 0x206   :  { %230 = vsyncpa [#allocation6], 1 }
 0x207   :  { %231 = vsyncpa [#allocation4], 1 }

</bundles_post_ra>
